<compile_context>
chip_gen: v7x
topology: tpu7x:2x2x1
jax: 0.10.0
libtpu: 0.0.40
codegen_flags: <defaults>
</compile_context>

<pallas_src>
import functools

import jax
import jax.numpy as jnp
from jax.experimental import pallas as pl
from jax.experimental.pallas import tpu as pltpu

_LANE = 128
_FAST_PATH_BYTES = 512 * 1024  # below this, XLA-fused jnp beats a kernel launch


def _round_up(a, b):
    return ((a + b - 1) // b) * b


def _trelu_kernel(x_ref, o_ref, *, offset):
    # Single fused VALU pass: relu(x) + (threshold - mean_shift).
    o_ref[...] = (jnp.maximum(x_ref[...], 0) + offset).astype(o_ref.dtype)


def _tile_params():
    """(target_tile_bytes, vmem_limit_bytes) chosen per TPU generation."""
    vmem = None
    try:
        info = pltpu.get_tpu_info()
        vmem = getattr(info, "vmem_capacity_bytes", None)
    except Exception:  # pragma: no cover - conservative fallback off-TPU
        vmem = None
    if vmem is not None and vmem > 96 * 1024 * 1024:
        # v5e / v6e: 128 MiB physical VMEM -> 8 MiB tiles (4 bufs = 32 MiB).
        return 8 * 1024 * 1024, 48 * 1024 * 1024
    # v7x-class (64 MiB per TC) or unknown: 4 MiB tiles (4 bufs = 16 MiB).
    return 4 * 1024 * 1024, 32 * 1024 * 1024


def _trelu_slab(slab, dtype, offset, sublane, target_tile_bytes,
                vmem_limit_bytes):
    rows, lane = slab.shape
    itemsize = jnp.dtype(dtype).itemsize

    # Tile sizing: ~target_tile_bytes per block, sublane-aligned rows, but
    # capped so the grid has >= 4 blocks (pipelining + v7x megacore sharding).
    rows_cap_bytes = max(
        sublane, (target_tile_bytes // (lane * itemsize)) // sublane * sublane)
    rows_cap_grid = _round_up(pl.cdiv(rows, 4), sublane)
    tile_rows = max(sublane, min(rows_cap_bytes, rows_cap_grid))
    if tile_rows >= rows:
        # Only reachable for tiny forced-Pallas inputs; one full block.
        tile_rows = rows
    grid = (pl.cdiv(rows, tile_rows),)

    kernel = functools.partial(_trelu_kernel, offset=offset)
    return pl.pallas_call(
        kernel,
        out_shape=jax.ShapeDtypeStruct((rows, lane), dtype),
        grid_spec=pltpu.PrefetchScalarGridSpec(
            num_scalar_prefetch=0,
            grid=grid,
            in_specs=[pl.BlockSpec((tile_rows, lane), lambda i: (i, 0))],
            out_specs=pl.BlockSpec((tile_rows, lane), lambda i: (i, 0)),
        ),
        compiler_params=pltpu.CompilerParams(
            # Independent streaming axis: shard across TensorCores (v7x).
            dimension_semantics=("parallel",),
            vmem_limit_bytes=vmem_limit_bytes,
        ),
    )(slab)


def trelu(x, threshold=-0.25, mean_shift=-0.03, *,
          min_pallas_bytes=_FAST_PATH_BYTES):
    """Elementwise relu(x) + threshold - mean_shift (PyTorch TRelu forward).

    Float dtypes only (matches the PyTorch module's float semantics).
    """
    orig_shape = x.shape
    dtype = x.dtype
    n = x.size
    offset = float(threshold) - (0.0 if mean_shift is None else float(mean_shift))

    # --- tiny-input fast path: kernel launch overhead beats any gain.
    if n == 0 or n * jnp.dtype(dtype).itemsize < min_pallas_bytes:
        return (jnp.maximum(x, 0) + offset).astype(dtype)

    flat = x.reshape(-1)
    itemsize = jnp.dtype(dtype).itemsize
    # Sub-32-bit dtypes pack along sublanes: min sublane multiple scales up.
    sublane = 8 * max(1, 4 // itemsize)
    target_tile_bytes, vmem_limit_bytes = _tile_params()

    # --- lane-dense slab layout (rows, lane); contiguous reshape = no copy.
    n_main = (n // _LANE) * _LANE
    lane = next(c for c in (1024, 512, 256, _LANE) if n_main % c == 0)
    rows = n_main // lane
    main = flat[:n_main].reshape(rows, lane)

    main_out = _trelu_slab(main, dtype, offset, sublane,
                           target_tile_bytes, vmem_limit_bytes)

    if n_main == n:
        return main_out.reshape(orig_shape)

    # Ragged tail (< 128 elements): plain jnp, then stitch back together.
    tail_out = (jnp.maximum(flat[n_main:], 0) + offset).astype(dtype)
    out_flat = jnp.concatenate([main_out.reshape(-1), tail_out])
    return out_flat.reshape(orig_shape)


def trelu_ref(x, threshold=-0.25, mean_shift=-0.03):
    y = jnp.maximum(x, 0.0) + threshold
    if mean_shift is not None:
        y = y - mean_shift
    return y.astype(x.dtype)


if __name__ == "__main__":
    key = jax.random.PRNGKey(0)

    # Spec-sized NCHW input (batch=2, channels=4, 16x16 spatial): 8 KiB ->
    # takes the fused-jnp fast path.
    x = jax.random.normal(key, (2, 4, 16, 16), dtype=jnp.float32)
    out = jax.block_until_ready(trelu(x))
    assert out.shape == x.shape and out.dtype == x.dtype
    assert jnp.allclose(out, trelu_ref(x), atol=1e-5, rtol=1e-5)

    # Same spec shape forced through the Pallas path (single full block).
    out_p = jax.block_until_ready(trelu(x, min_pallas_bytes=0))
    assert jnp.allclose(out_p, trelu_ref(x), atol=1e-5, rtol=1e-5)

    # Streaming-sized inputs that exercise the real Pallas path:
    #  (8,32,64,64)  f32  -> 4 MiB slab, even multi-block grid
    #  (5, 9,64,64)  f32  -> 720 KiB slab, partial trailing block
    for shape in ((8, 32, 64, 64), (5, 9, 64, 64)):
        k, key = jax.random.split(key)
        xi = jax.random.normal(k, shape, dtype=jnp.float32)
        oi = jax.block_until_ready(trelu(xi))
        assert jnp.allclose(oi, trelu_ref(xi), atol=1e-5, rtol=1e-5)

    # Ragged element count (not a multiple of 128) above the fast-path
    # threshold: Pallas main slab + jnp tail path.
    k, key = jax.random.split(key)
    xr = jax.random.normal(k, (129, 1031), dtype=jnp.float32)
    orr = jax.block_until_ready(trelu(xr))
    assert orr.shape == xr.shape and orr.dtype == xr.dtype
    assert jnp.allclose(orr, trelu_ref(xr), atol=1e-5, rtol=1e-5)

    # bf16 path (dtype-aware sublane multiple), large enough for Pallas.
    k, key = jax.random.split(key)
    xb = jax.random.normal(k, (8, 32, 64, 64), dtype=jnp.bfloat16)
    ob = jax.block_until_ready(trelu(xb))
    assert ob.dtype == xb.dtype
    assert jnp.allclose(ob.astype(jnp.float32),
                        trelu_ref(xb).astype(jnp.float32),
                        atol=2e-2, rtol=2e-2)

    print("KERNEL_OK")
</pallas_src>

<mosaic_0001>
module attributes {stable_mosaic.version = 11 : i64} {
  func.func @_trelu_kernel(%arg0: i32, %arg1: memref<2x1024xf32, #tpu.memory_space<vmem>>, %arg2: memref<2x1024xf32, #tpu.memory_space<vmem>>) attributes {dimension_semantics = [#tpu.dimension_semantics<parallel>], iteration_bounds = array<i64: 1>, scalar_prefetch = 0 : i64, scratch_operands = 0 : i64, tpu.core_type = #tpu.core_type<tc>, window_params = [{transform_indices = @transform_0, window_bounds = array<i64: 2, 1024>}, {transform_indices = @transform_1, window_bounds = array<i64: 2, 1024>}]} {
    %c0 = arith.constant 0 : index
    %c0_0 = arith.constant 0 : index
    %0 = vector.load %arg1[%c0, %c0_0] : memref<2x1024xf32, #tpu.memory_space<vmem>>, vector<2x1024xf32>
    %cst = arith.constant 0.000000e+00 : f32
    %1 = vector.broadcast %cst : f32 to vector<2x1024xf32>
    %2 = arith.maximumf %0, %1 : vector<2x1024xf32>
    %cst_1 = arith.constant -2.200000e-01 : f32
    %3 = vector.broadcast %cst_1 : f32 to vector<2x1024xf32>
    %4 = arith.addf %2, %3 : vector<2x1024xf32>
    %c0_2 = arith.constant 0 : index
    %c0_3 = arith.constant 0 : index
    %5 = vector.load %arg2[%c0_2, %c0_3] : memref<2x1024xf32, #tpu.memory_space<vmem>>, vector<2x1024xf32>
    tpu.vector_store %arg2[%c0_2, %c0_3], %4 {strides = array<i32>} : memref<2x1024xf32, #tpu.memory_space<vmem>>, vector<2x1024xf32>,
    return
  }
  func.func @transform_0(%arg0: i32) -> (i32, i32) {
    %c0_i32 = arith.constant 0 : i32
    %c0_i32_0 = arith.constant 0 : i32
    return %arg0, %c0_i32 : i32, i32
  }
  func.func @transform_1(%arg0: i32) -> (i32, i32) {
    %c0_i32 = arith.constant 0 : i32
    %c0_i32_0 = arith.constant 0 : i32
    return %arg0, %c0_i32 : i32, i32
  }
}

</mosaic_0001>

<bundles_post_ra>
// kernel: tpu_custom_call.1
= control target key start
LH: loop header
LB: loop body
LE: loop exit
PB: predicated region body
PF: predicated region fallthrough
CT: control target
= control target key end

     0   :  { %6 = vsyncpa [#allocation3], 0  ;;  %s130_s0 = inlined_call_operand.hbm [shape: f32[2,1024], index: 0, kind: input, shape index: {}]   ;;  %s131_s1 = inlined_call_operand.hbm [shape: f32[2,1024], index: 1, kind: output, shape index: {}]  }
   0x1   :  { %7 = vsyncpa [#allocation4], 0  ;;  %s94_s6 = smov [#allocation2]   ;;  %s46_s10 = scalar_lea.hbm %s130_s0, 256 }
   0x2   :  { %s14_s7 = sshll.u32 %s94_s6, 4  ;;  %p47_p0 = scmp.ne.s32.totalorder %s130_s0, %s46_s10  ;;  %s15_s7 = int_to_ptr.vmem [resolvable:$true] %s14_s7 }
   0x3   :  { %p50_p1 = scmp.lt.u32.totalorder %s46_s10, %s130_s0 }
   0x5   :  { %p52_p2 = pnand %p50_p1, %p47_p0 }
   0x7   :  { %55 = shalt.err (!%p52_p2)
}
   0x8   :  { %s56_s15 = scalar_lea.vmem %s15_s7, 256  ;;  %p61_p4 = scmp.lt.s32.totalorder %s15_s7, %s15_s7 }
   0x9   :  { %p57_p3 = scmp.ne.s32.totalorder %s15_s7, %s56_s15  ;;  %p62_p5 = scmp.lt.s32.totalorder %s56_s15, %s56_s15 }
   0xb   :  { %p63_p6 = por %p62_p5, %p61_p4 }
   0xd   :  { %p64_p7 = pnand %p63_p6, %p57_p3 }
   0xf   :  { %67 = shalt.err (!%p64_p7)
}
  0x10   :  { %17 = dma.hbm_to_vmem [thread:$0]  %s130_s0, 256, %s15_s7, [#allocation3]  }
  0x11   :  { %90 = dma.done.wait [#allocation3], 256  }
  0x12   :  { %91 = vsyncadd [#allocation3], 4294967040  ;;  %v21_v0 = vld [vmem:[#allocation2] sm:$0xff]  ;;  %v22_v1 = vld [vmem:[#allocation2 + $0x8] sm:$0xff]  ;;  %s95_s18 = smov [#allocation5]  }
  0x13   :  { %s35_s19 = sshll.u32 %s95_s18, 4  ;;  %v23_v2 = vmax.f32 %v21_v0, 0.0  ;;  %v24_v3 = vmax.f32 %v22_v1, 0.0  ;;  %s36_s19 = int_to_ptr.vmem [resolvable:$true] %s35_s19 }
  0x14   :  { %s68_s20 = scalar_lea.vmem %s36_s19, 256  ;;  %p73_p9 = scmp.lt.s32.totalorder %s36_s19, %s36_s19 }
  0x15   :  { %v25_v4 = vadd.f32 -0.22, %v23_v2  ;;  %v26_v5 = vadd.f32 -0.22, %v24_v3  ;;  %p69_p8 = scmp.ne.s32.totalorder %s36_s19, %s68_s20  ;;  %p74_p10 = scmp.lt.s32.totalorder %s68_s20, %s68_s20 }
  0x17   :  { %27 = vst [vmem:[#allocation5] sm:$0xff] %v25_v4  ;;  %28 = vst [vmem:[#allocation5 + $0x8] sm:$0xff] %v26_v5  ;;  %p75_p11 = por %p74_p10, %p73_p9 }
  0x19   :  { %p76_p12 = pnand %p75_p11, %p69_p8 }
  0x1b   :  { %79 = shalt.err (!%p76_p12)
}
  0x1c   :  { %s80_s22 = scalar_lea.hbm %s131_s1, 256 }
  0x1d   :  { %p81_p13 = scmp.ne.s32.totalorder %s131_s1, %s80_s22  ;;  %p84_p0 = scmp.lt.u32.totalorder %s80_s22, %s131_s1 }
  0x1f   :  { %p86_p1 = pnand %p84_p0, %p81_p13 }
  0x21   :  { %89 = shalt.err (!%p86_p1)
}
  0x22   :  { %38 = dma.vmem_to_hbm [thread:$0]  %s36_s19, 256, %s131_s1, [#allocation4]  }
  0x23   :  { %92 = dma.done.wait [#allocation4], 256  }
  0x24   :  { %93 = vsyncadd [#allocation4], 4294967040 }
  0x25   :  { %42 = vsyncpa [#allocation3], 1 }
  0x26   :  { %43 = vsyncpa [#allocation4], 1 }

</bundles_post_ra>
